<compile_context>
chip_gen: v6e
topology: v6e:2x2x1
jax: 0.10.0
libtpu: 0.0.40
codegen_flags: <defaults>
</compile_context>

<pallas_src>
import functools

import jax
import jax.numpy as jnp
from jax import lax
from jax.experimental import pallas as pl
from jax.experimental.pallas import tpu as pltpu


def _round_up(x: int, m: int) -> int:
    return (x + m - 1) // m * m


def _qhead_kernel(x_ref, w1_ref, b1_ref, w2_ref, b2_ref, o_ref, *,
                  no_first: bool, use_sigmoid: bool):
    if not no_first:
        # dense: x @ W1 + b1 — bf16 operands on the MXU, f32 accumulation.
        h = jnp.dot(x_ref[...], w1_ref[...],
                    preferred_element_type=jnp.float32)
        h = h + b1_ref[...].astype(jnp.float32)
        # tanh-approx GELU -> transcendental goes to the EUP slot.
        h = jax.nn.gelu(h, approximate=True)
    else:
        h = x_ref[...].astype(jnp.float32)

    # dense2, lane-dense: w2_rows [8, H] (rows identical) contracted against
    # h [tm, H] over H -> [8, tm]; row 0 is the score row with tm on lanes.
    s8 = lax.dot_general(w2_ref[...], h,
                         dimension_numbers=(((1,), (1,)), ((), ())),
                         preferred_element_type=jnp.float32)
    s = s8[0:1, :] + b2_ref[0]          # b2 is an SMEM scalar
    if use_sigmoid:
        s = jax.nn.sigmoid(s)
    o_ref[...] = s.astype(o_ref.dtype)  # unmasked, lane-dense store [1, tm]


def roberta_qhead(x, w1, b1, w2, b2, *, no_first=False, finalact="sigmoid",
                  block_rows=512):
    """x: [B, S, H]. w1: [H, H] (dense.weight.T), b1: [H], w2: [H, 1], b2: [1].

    Returns [B, S] (sigmoid scores, or raw scores if finalact == 'no').
    When no_first=True (torch 'linear-*' finalact), w1/b1 may be None.
    """
    B, S, H = x.shape
    out_dtype = x.dtype
    R = B * S
    x2 = x.reshape(R, H)

    # Row tile: large (default 512) for HBM efficiency, multiple of 8, padded
    # rows instead of an assert. (On v7x keep R/tm >= 2 so both TCs are used.)
    tm = _round_up(min(block_rows, R), 8)
    R_pad = _round_up(R, tm)
    if R_pad != R:
        x2 = jnp.pad(x2, ((0, R_pad - R), (0, 0)))
    n_tiles = R_pad // tm

    if no_first:
        # dense layer absent; pass tiny unused placeholders.
        x_in = x2.astype(jnp.float32)
        w1_in = jnp.zeros((1, H), dtype=jnp.bfloat16)
        b1_in = jnp.zeros((1, H), dtype=jnp.float32)
        w1_spec = pl.BlockSpec((1, H), lambda i: (0, 0))
    else:
        # bf16 for the dominant MXU streams; biases stay f32.
        x_in = x2.astype(jnp.bfloat16)
        w1_in = w1.astype(jnp.bfloat16)
        b1_in = b1.reshape(1, H).astype(jnp.float32)
        w1_spec = pl.BlockSpec((H, H), lambda i: (0, 0))

    # Replicate w2 over 8 sublanes so the NT matmul has an aligned [8, H] lhs.
    w2_in = jnp.tile(w2.reshape(1, H).astype(jnp.float32), (8, 1))
    b2_in = b2.reshape(1).astype(jnp.float32)

    kernel = functools.partial(
        _qhead_kernel, no_first=no_first, use_sigmoid=(finalact == "sigmoid"))

    out = pl.pallas_call(
        kernel,
        out_shape=jax.ShapeDtypeStruct((n_tiles, 1, tm), out_dtype),
        grid_spec=pltpu.PrefetchScalarGridSpec(
            num_scalar_prefetch=0,
            grid=(n_tiles,),
            in_specs=[
                pl.BlockSpec((tm, H), lambda i: (i, 0)),     # x row tile
                w1_spec,                                     # W1 (resident)
                pl.BlockSpec((1, H), lambda i: (0, 0)),      # b1
                pl.BlockSpec((8, H), lambda i: (0, 0)),      # w2 rows
                pl.BlockSpec(memory_space=pltpu.MemorySpace.SMEM),  # b2 scalar
            ],
            out_specs=pl.BlockSpec((None, 1, tm), lambda i: (i, 0, 0)),
        ),
        compiler_params=pltpu.CompilerParams(
            dimension_semantics=("parallel",),
        ),
    )(x_in, w1_in, b1_in, w2_in, b2_in)

    return out.reshape(R_pad)[:R].reshape(B, S)


# ----------------------------- references ----------------------------------


def _reference_exact(x2, w1, b1, w2, b2):
    """Pure f32, exact-erf GELU (matches torch F.gelu default)."""
    h = x2 @ w1 + b1.reshape(-1)
    h = 0.5 * h * (1.0 + lax.erf(h / jnp.sqrt(2.0)))
    s = h @ w2 + b2.reshape(-1)
    return jax.nn.sigmoid(s)[:, 0]


def _reference_kernel_math(x2, w1, b1, w2, b2):
    """Same numeric recipe as the kernel (bf16 matmul, tanh GELU)."""
    h = jnp.dot(x2.astype(jnp.bfloat16), w1.astype(jnp.bfloat16),
                preferred_element_type=jnp.float32) + b1.reshape(-1)
    h = jax.nn.gelu(h, approximate=True)
    s = h @ w2 + b2.reshape(-1)
    return jax.nn.sigmoid(s)[:, 0]


if __name__ == "__main__":
    B, S, H = 2, 8, 32  # small shapes consistent with hidden_size=H
    key = jax.random.PRNGKey(0)
    kx, kw1, kb1, kw2, kb2 = jax.random.split(key, 5)

    x = jax.random.normal(kx, (B, S, H), dtype=jnp.float32)
    # Deterministic synthetic parameters (torch Linear shapes, pre-transposed):
    w1 = 0.02 * jax.random.normal(kw1, (H, H), dtype=jnp.float32)   # dense.weight.T
    b1 = 0.02 * jax.random.normal(kb1, (H,), dtype=jnp.float32)     # dense.bias
    w2 = 0.02 * jax.random.normal(kw2, (H, 1), dtype=jnp.float32)   # dense2.weight.T
    b2 = 0.02 * jax.random.normal(kb2, (1,), dtype=jnp.float32)     # dense2.bias

    # Default head: dense + GELU + dense2 + sigmoid.
    out = roberta_qhead(x, w1, b1, w2, b2, no_first=False, finalact="sigmoid")
    out = jax.block_until_ready(out)
    assert out.shape == (B, S)

    ref_match = _reference_kernel_math(x.reshape(-1, H), w1, b1, w2, b2).reshape(B, S)
    ref_exact = _reference_exact(x.reshape(-1, H), w1, b1, w2, b2).reshape(B, S)
    assert jnp.allclose(out, ref_match, atol=5e-3, rtol=5e-3), "mismatch vs kernel-math ref"
    assert jnp.allclose(out, ref_exact, atol=3e-2, rtol=3e-2), "mismatch vs exact-f32 ref"

    # 'linear-no' variant: no first dense, identity final activation.
    out2 = roberta_qhead(x, None, None, w2, b2, no_first=True, finalact="no")
    out2 = jax.block_until_ready(out2)
    ref2 = (x.reshape(-1, H) @ w2 + b2)[:, 0].reshape(B, S)
    assert jnp.allclose(out2, ref2, atol=5e-3, rtol=5e-3), "mismatch in no_first path"

    print("KERNEL_OK")
</pallas_src>

<mosaic_0001>
module attributes {stable_mosaic.version = 11 : i64} {
  func.func @_qhead_kernel(%arg0: i32, %arg1: memref<16x32xbf16, #tpu.memory_space<vmem>>, %arg2: memref<32x32xbf16, #tpu.memory_space<vmem>>, %arg3: memref<1x32xf32, #tpu.memory_space<vmem>>, %arg4: memref<8x32xf32, #tpu.memory_space<vmem>>, %arg5: memref<1xf32, #tpu.memory_space<smem>>, %arg6: memref<1x1x16xf32, #tpu.memory_space<vmem>>) attributes {dimension_semantics = [#tpu.dimension_semantics<parallel>], iteration_bounds = array<i64: 1>, scalar_prefetch = 0 : i64, scratch_operands = 0 : i64, tpu.core_type = #tpu.core_type<tc>, window_params = [{transform_indices = @transform_0, window_bounds = array<i64: 16, 32>}, {pipeline_mode = #tpu.pipeline_mode<synchronous>, transform_indices = @transform_1, window_bounds = array<i64: 32, 32>}, {pipeline_mode = #tpu.pipeline_mode<synchronous>, transform_indices = @transform_2, window_bounds = array<i64: 1, 32>}, {pipeline_mode = #tpu.pipeline_mode<synchronous>, transform_indices = @transform_3, window_bounds = array<i64: 8, 32>}, {transform_indices = @transform_4, window_bounds = array<i64: 1>}, {transform_indices = @transform_5, window_bounds = array<i64: 1, 1, 16>}]} {
    %c0 = arith.constant 0 : index
    %c0_0 = arith.constant 0 : index
    %0 = vector.load %arg1[%c0, %c0_0] : memref<16x32xbf16, #tpu.memory_space<vmem>>, vector<16x32xbf16>
    %c0_1 = arith.constant 0 : index
    %c0_2 = arith.constant 0 : index
    %1 = vector.load %arg2[%c0_1, %c0_2] : memref<32x32xbf16, #tpu.memory_space<vmem>>, vector<32x32xbf16>
    %cst = arith.constant dense<0.000000e+00> : vector<16x32xf32>
    %2 = tpu.matmul %0, %1, %cst {dimension_numbers = #tpu.dot_dimension_numbers<[1], [0], [0], [1], [0, 0, 1, 1], [], []>} : vector<16x32xbf16>, vector<32x32xbf16>, vector<16x32xf32> -> vector<16x32xf32>
    %c0_3 = arith.constant 0 : index
    %c0_4 = arith.constant 0 : index
    %3 = vector.load %arg3[%c0_3, %c0_4] : memref<1x32xf32, #tpu.memory_space<vmem>>, vector<1x32xf32>
    %4 = vector.broadcast %3 : vector<1x32xf32> to vector<16x32xf32>
    %5 = arith.addf %2, %4 : vector<16x32xf32>
    %6 = arith.mulf %5, %5 : vector<16x32xf32>
    %7 = arith.mulf %5, %6 : vector<16x32xf32>
    %cst_5 = arith.constant 4.471500e-02 : f32
    %8 = vector.broadcast %cst_5 : f32 to vector<16x32xf32>
    %9 = arith.mulf %8, %7 : vector<16x32xf32>
    %10 = arith.addf %5, %9 : vector<16x32xf32>
    %cst_6 = arith.constant 0.797884583 : f32
    %11 = vector.broadcast %cst_6 : f32 to vector<16x32xf32>
    %12 = arith.mulf %11, %10 : vector<16x32xf32>
    %13 = math.tanh %12 : vector<16x32xf32>
    %cst_7 = arith.constant 1.000000e+00 : f32
    %14 = vector.broadcast %cst_7 : f32 to vector<16x32xf32>
    %15 = arith.addf %14, %13 : vector<16x32xf32>
    %cst_8 = arith.constant 5.000000e-01 : f32
    %16 = vector.broadcast %cst_8 : f32 to vector<16x32xf32>
    %17 = arith.mulf %16, %15 : vector<16x32xf32>
    %18 = arith.mulf %5, %17 : vector<16x32xf32>
    %c0_9 = arith.constant 0 : index
    %c0_10 = arith.constant 0 : index
    %19 = vector.load %arg4[%c0_9, %c0_10] : memref<8x32xf32, #tpu.memory_space<vmem>>, vector<8x32xf32>
    %cst_11 = arith.constant dense<0.000000e+00> : vector<8x16xf32>
    %20 = tpu.matmul %19, %18, %cst_11 {dimension_numbers = #tpu.dot_dimension_numbers<[1], [1], [0], [0], [0, 0, 1, 0], [], []>} : vector<8x32xf32>, vector<16x32xf32>, vector<8x16xf32> -> vector<8x16xf32>
    %21 = vector.extract_strided_slice %20 {offsets = [0, 0], sizes = [1, 16], strides = [1, 1]} : vector<8x16xf32> to vector<1x16xf32>
    %c0_12 = arith.constant 0 : index
    %22 = memref.load %arg5[%c0_12] : memref<1xf32, #tpu.memory_space<smem>>
    %23 = vector.broadcast %22 : f32 to vector<1x16xf32>
    %24 = arith.addf %21, %23 : vector<1x16xf32>
    %25 = arith.negf %24 : vector<1x16xf32>
    %26 = math.exp %25 : vector<1x16xf32>
    %cst_13 = arith.constant 1.000000e+00 : f32
    %27 = vector.broadcast %cst_13 : f32 to vector<1x16xf32>
    %28 = arith.addf %27, %26 : vector<1x16xf32>
    %29 = arith.divf %27, %28 : vector<1x16xf32>
    %c0_14 = arith.constant 0 : index
    %c0_15 = arith.constant 0 : index
    %c0_16 = arith.constant 0 : index
    %30 = vector.load %arg6[%c0_14, %c0_15, %c0_16] : memref<1x1x16xf32, #tpu.memory_space<vmem>>, vector<1x1x16xf32>
    %31 = vector.shape_cast %30 : vector<1x1x16xf32> to vector<1x16xf32>
    %32 = vector.shape_cast %29 : vector<1x16xf32> to vector<1x1x16xf32>
    tpu.vector_store %arg6[%c0_14, %c0_15, %c0_16], %32 {strides = array<i32>} : memref<1x1x16xf32, #tpu.memory_space<vmem>>, vector<1x1x16xf32>,
    return
  }
  func.func @transform_0(%arg0: i32) -> (i32, i32) {
    %c0_i32 = arith.constant 0 : i32
    %c0_i32_0 = arith.constant 0 : i32
    return %arg0, %c0_i32 : i32, i32
  }
  func.func @transform_1(%arg0: i32) -> (i32, i32) {
    %c0_i32 = arith.constant 0 : i32
    %c0_i32_0 = arith.constant 0 : i32
    %c0_i32_1 = arith.constant 0 : i32
    return %c0_i32, %c0_i32_0 : i32, i32
  }
  func.func @transform_2(%arg0: i32) -> (i32, i32) {
    %c0_i32 = arith.constant 0 : i32
    %c0_i32_0 = arith.constant 0 : i32
    %c0_i32_1 = arith.constant 0 : i32
    return %c0_i32, %c0_i32_0 : i32, i32
  }
  func.func @transform_3(%arg0: i32) -> (i32, i32) {
    %c0_i32 = arith.constant 0 : i32
    %c0_i32_0 = arith.constant 0 : i32
    %c0_i32_1 = arith.constant 0 : i32
    return %c0_i32, %c0_i32_0 : i32, i32
  }
  func.func @transform_4(%arg0: i32) -> i32 {
    %c0_i32 = arith.constant 0 : i32
    %c0_i32_0 = arith.constant 0 : i32
    return %c0_i32 : i32
  }
  func.func @transform_5(%arg0: i32) -> (i32, i32, i32) {
    %c0_i32 = arith.constant 0 : i32
    %c0_i32_0 = arith.constant 0 : i32
    %c0_i32_1 = arith.constant 0 : i32
    return %arg0, %c0_i32, %c0_i32_0 : i32, i32, i32
  }
}

</mosaic_0001>

<bundles_post_ra>
// kernel: tpu_custom_call.1
= control target key start
LH: loop header
LB: loop body
LE: loop exit
PB: predicated region body
PF: predicated region fallthrough
CT: control target
= control target key end

     0   :  { %11 = vsyncpa [#allocation4], 0  ;;  %s457_s0 = inlined_call_operand.hbm [shape: bf16[16,32], index: 0, kind: input, shape index: {}]   ;;  %s458_s1 = inlined_call_operand.hbm [shape: bf16[32,32], index: 1, kind: input, shape index: {}]   ;;  %s459_s2 = inlined_call_operand.vmem [shape: f32[1,32], index: 2, kind: input, shape index: {}]   ;;  %s460_s3 = inlined_call_operand.hbm [shape: f32[8,32], index: 3, kind: input, shape index: {}]   ;;  %s461_s4 = inlined_call_operand.<no memory space> [shape: f32[1], index: 4, kind: input, shape index: {}]   ;;  %s462_s5 = inlined_call_operand.hbm [shape: f32[1,1,16], index: 5, kind: output, shape index: {}]  }
   0x1   :  { %12 = vsyncpa [#allocation7], 0 }
   0x2   :  { %13 = vsyncpa [#allocation5], 0  ;;  %s397_s18 = smov [#allocation6]   ;;  %s398_s20 = smov [#allocation3]  }
   0x3   :  { %s31_s19 = sshll.u32 %s397_s18, 4  ;;  %s19_s21 = sshll.u32 %s398_s20, 4  ;;  %s32_s19 = int_to_ptr.vmem [resolvable:$true] %s31_s19  ;;  %s20_s21 = int_to_ptr.vmem [resolvable:$true] %s19_s21 }
   0x4   :  { %s319_s22 = scalar_lea.vmem %s32_s19, 256  ;;  %p324_p1 = scmp.lt.s32.totalorder %s32_s19, %s32_s19 }
   0x5   :  { %p320_p0 = scmp.ne.s32.totalorder %s32_s19, %s319_s22  ;;  %p325_p2 = scmp.lt.s32.totalorder %s319_s22, %s319_s22 }
   0x7   :  { %p326_p3 = por %p325_p2, %p324_p1 }
   0x9   :  { %p327_p4 = pnand %p326_p3, %p320_p0 }
   0xb   :  { %330 = shalt.err (!%p327_p4)
}
   0xc   :  { %s399_s23 = smov 64   ;;  %s400_s24 = smov 4  }
   0xd   :  { %37 = dma.hbm_to_vmem [thread:$0]  %s458_s1, 256, %s32_s19, [#allocation7], %s399_s23, %s399_s23, %s400_s24  }
   0xe   :  { %s339_s27 = scalar_lea.vmem %s20_s21, 128  ;;  %p344_p6 = scmp.lt.s32.totalorder %s20_s21, %s20_s21 }
   0xf   :  { %p340_p5 = scmp.ne.s32.totalorder %s20_s21, %s339_s27  ;;  %p345_p7 = scmp.lt.s32.totalorder %s339_s27, %s339_s27 }
  0x11   :  { %p346_p8 = por %p345_p7, %p344_p6 }
  0x13   :  { %p347_p9 = pnand %p346_p8, %p340_p5 }
  0x15   :  { %350 = shalt.err (!%p347_p9)
}
  0x16   :  { %25 = dma.hbm_to_vmem [thread:$0]  %s457_s0, 128, %s20_s21, [#allocation4], %s399_s23, %s399_s23, %s400_s24  }
  0x17   :  { %s401_s30 = smov [#allocation8]  }
  0x18   :  { %s46_s6 = sshll.u32 %s401_s30, 4  ;;  %s47_s6 = int_to_ptr.vmem [resolvable:$true] %s46_s6 }
  0x19   :  { %s359_s7 = scalar_lea.vmem %s47_s6, 128  ;;  %p364_p11 = scmp.lt.s32.totalorder %s47_s6, %s47_s6 }
  0x1a   :  { %p360_p10 = scmp.ne.s32.totalorder %s47_s6, %s359_s7  ;;  %p365_p12 = scmp.lt.s32.totalorder %s359_s7, %s359_s7 }
  0x1c   :  { %p366_p13 = por %p365_p12, %p364_p11 }
  0x1e   :  { %p367_p0 = pnand %p366_p13, %p360_p10 }
  0x20   :  { %370 = shalt.err (!%p367_p0)
}
  0x21   :  { %49 = dma.hbm_to_vmem [thread:$0]  %s460_s3, 128, %s47_s6, [#allocation7]  }
  0x22   :  { %391 = dma.done.wait [#allocation4], 128  }
  0x23   :  { %392 = vsyncadd [#allocation4], 4294967168 }
  0x24   :  { %393 = dma.done.wait [#allocation7], 384  }
  0x25   :  { %394 = vsyncadd [#allocation7], 4294966912  ;;  %v402_v0 = vmov 0.0   ;;  %vm403_vm0 = vmmov 0   ;;  %v300_v1 = vld [vmem:[#allocation6 + $0x8] sm:$0xff]   ;;  %v301_v2 = vld [vmem:[#allocation6] sm:$0xff]   ;;  %v236_v30 = vstv %s461_s4 }
  0x26   :  { %277 = vmatprep.subr.bf16.mxu0 %v402_v0  ;;  %281 = vmatprep.mubr.msk.bf16.mxu0 %vm403_vm0, %v402_v0  ;;  %v302_v3 = vld [vmem:[#allocation3] sm:$0xff]   ;;  %vm92_vm1 = vcmask 261120   ;;  %v155_v29 = vld [vmem:[#allocation8] sm:$0xff]  ;;  %s404_s10 = smov [#allocation9]   ;;  %vm244_vm2 = vcmask 122880  }
  0x27   :  { %285 = vmatprep.subr.mxu1 %v402_v0  ;;  %289 = vmatprep.mubr.msk.f32.mxu1 %vm403_vm0, %v402_v0  ;;  %v262_v4 = vld [vmem:[%s459_s2] ss:$0 sm:$0xff]  ;;  %s252_s11 = sshll.u32 %s404_s10, 4  ;;  %s253_s11 = int_to_ptr.vmem [resolvable:$true] %s252_s11 }
  0x28   :  { %278 = vmatpush3.bf16.msra.mxu0 %v300_v1  ;;  %s371_s12 = scalar_lea.vmem %s253_s11, 16  ;;  %s375_s13 = scalar_lea.vmem %s253_s11, 32 }
  0x29   :  { %279 = vmatprep.subr.bf16.mxu0 %v402_v0  ;;  %p372_p1 = scmp.ne.s32.totalorder %s253_s11, %s371_s12  ;;  %p376_p2 = scmp.lt.s32.totalorder %s253_s11, %s253_s11 }
  0x2a   :  { %p377_p3 = scmp.lt.s32.totalorder %s375_s13, %s371_s12 }
  0x2c   :  { %280 = vmatpush3.bf16.msra.mxu0 %v301_v2  ;;  %p378_p4 = por %p377_p3, %p376_p2 }
  0x2e   :  { %p379_p5 = pnand %p378_p4, %p372_p1 }
  0x2f   :  { %282 = vmatmul.mubr.msk.bf16.vlgmr.msra.gmra.mxu0 %vm92_vm1, %v302_v3 }
  0xef   :  { %v130_v5 = vpop.f32.mrf.mxu0 }
  0xf0   :  { %v131_v6 = vadd.f32 %v262_v4, %v130_v5 }
  0xf1   :  { %v283_v7 = vpop.f32.mrf.mxu0 }
  0xf2   :  { %v137_v8 = vmul.f32 %v131_v6, %v131_v6 }
  0xf3   :  { %v133_v9 = vpop.f32.mrf.mxu0 }
  0xf4   :  { %v139_v10 = vmul.f32 %v137_v8, %v131_v6  ;;  %v134_v11 = vadd.f32 %v262_v4, %v133_v9 }
  0xf5   :  { %v284_v12 = vpop.f32.mrf.mxu0 }
  0xf6   :  { %v141_v13 = vmul.f32 0.044715, %v139_v10  ;;  %v138_v14 = vmul.f32 %v134_v11, %v134_v11 }
  0xf8   :  { %v143_v15 = vadd.f32 %v141_v13, %v131_v6  ;;  %v140_v16 = vmul.f32 %v138_v14, %v134_v11 }
  0xfa   :  { %v145_v17 = vmul.f32 0.7978846, %v143_v15  ;;  %v142_v18 = vmul.f32 0.044715, %v140_v16 }
  0xfc   :  { %v144_v19 = vadd.f32 %v142_v18, %v134_v11  ;;  %303 = vtanh.f32 %v145_v17 }
  0xfe   :  { %v146_v20 = vmul.f32 0.7978846, %v144_v19 }
 0x100   :  { %305 = vtanh.f32 %v146_v20 }
 0x109   :  { %v304_v21 = vpop.eup %303 }
 0x10a   :  { %v149_v24 = vadd.f32 1.0, %v304_v21 }
 0x10c   :  { %v151_v27 = vmul.f32 0.5, %v149_v24 }
 0x10d   :  { %v306_v22 = vpop.eup %305 }
 0x10e   :  { %v150_v23 = vadd.f32 1.0, %v306_v22  ;;  %v153_v28 = vmul.f32 %v151_v27, %v131_v6 }
 0x110   :  { %v152_v25 = vmul.f32 0.5, %v150_v23 }
 0x112   :  { %v154_v26 = vmul.f32 %v152_v25, %v134_v11 }
 0x114   :  { %286 = vmatpush3.xpose.msk.msra.mxu1 %vm92_vm1, %v154_v26 }
 0x115   :  { %287 = vmatprep.subr.mxu1 %v402_v0 }
 0x118   :  { %288 = vmatpush3.xpose.msk.msra.mxu1 %vm92_vm1, %v153_v28 }
 0x11b   :  { %290 = vmatmul.mubr.msk.f32.vlgmr.msra.gmra.mxu1 %vm92_vm1, %v155_v29 }
 0x1db   :  { %v231_v31 = vpop.f32.mrf.mxu1 }
 0x1dc   :  { %v237_v32 = vadd.f32 %v236_v30, %v231_v31 }
 0x1dd   :  { %v291_v33 = vpop.f32.mrf.mxu1 }
 0x1de   :  { %v270_v34 = vmul.f32 -1.442695, %v237_v32 }
 0x1e0   :  { %307 = vpow2.f32 %v270_v34 }
 0x1ed   :  { %v308_v35 = vpop.eup %307 }
 0x1ee   :  { %v241_v36 = vadd.f32 1.0, %v308_v35 }
 0x1f0   :  { %309 = vrcp.f32 %v241_v36 }
 0x1fd   :  { %v310_v37 = vpop.eup %309 }
 0x1fe   :  { %245 = vst.msk [vmem:[#allocation9] sm:$0x1] %vm244_vm2, %v310_v37 }
 0x1ff   :  { %382 = shalt.err (!%p379_p5)
}
 0x200   :  { %255 = dma.vmem_to_hbm [thread:$0]  %s253_s11, 16, %s462_s5, [#allocation5]  }
 0x201   :  { %395 = dma.done.wait [#allocation5], 16  }
 0x202   :  { %396 = vsyncadd [#allocation5], 4294967280 }
 0x203   :  { %259 = vsyncpa [#allocation4], 1 }
 0x204   :  { %260 = vsyncpa [#allocation7], 1 }
 0x205   :  { %261 = vsyncpa [#allocation5], 1 }

</bundles_post_ra>
